<compile_context>
chip_gen: v7x
topology: tpu7x:2x2x1
jax: 0.10.0
libtpu: 0.0.40
codegen_flags: <defaults>
</compile_context>

<pallas_src>
import jax
import jax.numpy as jnp
from jax.experimental import pallas as pl
from jax.experimental.pallas import tpu as pltpu

# ---------------------------------------------------------------------------
# Model configuration (synthetic, deterministic)
# ---------------------------------------------------------------------------
NUM_CATEGORIES = [10, 7, 5, 12]       # F = 4 categorical features
EMB_DIM = 4                           # fixed by nn.Embedding(n, 4)
HIDDEN = 32                           # hidden_size
LAYERS = 2                            # inner Linear(hidden, hidden) layers
OUT_DIM = 2                           # last Linear(hidden, 2)
BATCH = 8

F_FEATS = len(NUM_CATEGORIES)
IN_DIM = EMB_DIM * F_FEATS            # 16
SUM_N = sum(NUM_CATEGORIES)           # 34 total embedding rows
OFFSETS = [sum(NUM_CATEGORIES[:i]) for i in range(F_FEATS)]  # row offset per feature

# Demo stays f32 to match the f32 reference tightly; switch to jnp.bfloat16 for
# large-batch runs on v6e/v7x (MXU bf16 rate; accumulation remains f32).
COMPUTE_DTYPE = jnp.float32


def _round_up(x, m):
    return ((x + m - 1) // m) * m


W_PAGE_ROWS = max(_round_up(SUM_N, 8), HIDDEN)   # 40 (sublane-aligned page height)
W_PAGE_COLS = HIDDEN                             # 32 (>= OUT_DIM)
N_W_PAGES = LAYERS + 2                           # folded(emb+first), inner*LAYERS, last
N_B_PAGES = LAYERS + 2                           # first, inner*LAYERS, last


# ---------------------------------------------------------------------------
# Fused kernel: one-hot MXU embedding lookup folded into the MLP
# ---------------------------------------------------------------------------
def fused_kernel(xcat_ref, w_ref, b_ref, o_ref):
    tb = xcat_ref.shape[0]
    cdt = w_ref.dtype                                        # f32 (or bf16) operands
    xcat = xcat_ref[...]                                     # (TB, F) int32

    # ---- one-hot over the block-diagonal embedding row space ----------------
    # mask[b, c] = 1 iff c == Xcat[b, i] + OFFSETS[i] for some feature i.
    # Built with compares + integer ORs and a single cast (cheap on the VALU).
    iota = jax.lax.broadcasted_iota(jnp.int32, (tb, W_PAGE_ROWS), 1)
    mask = iota == (xcat[:, 0:1] + OFFSETS[0])
    for i in range(1, F_FEATS):                              # statically unrolled (F=4)
        mask = mask | (iota == (xcat[:, i:i + 1] + OFFSETS[i]))
    onehot = mask.astype(cdt)                                # (TB, 40)

    # ---- folded (embedding @ first) layer, then inner layers, then last -----
    # w_ref[0] == E_blockdiag @ W_first  (exact algebraic fusion, no nonlinearity
    # between the lookup and the first Linear).
    h = jnp.dot(onehot, w_ref[0], preferred_element_type=jnp.float32)      # (TB, 32)
    h = jnp.maximum(h + b_ref[0], 0.0)
    for l in range(LAYERS):
        h = jnp.dot(h.astype(cdt), w_ref[1 + l, :HIDDEN, :],
                    preferred_element_type=jnp.float32)
        h = jnp.maximum(h + b_ref[1 + l], 0.0)
    out = jnp.dot(h.astype(cdt), w_ref[1 + LAYERS, :HIDDEN, :],
                  preferred_element_type=jnp.float32)
    out = jnp.maximum(out + b_ref[1 + LAYERS], 0.0)          # cols >= OUT_DIM stay 0

    # Lane-dense store of the full (TB, 32) slab; wrapper slices to OUT_DIM.
    o_ref[...] = out.astype(o_ref.dtype)


def run_fused_kernel(xcat, w_slab, b_slab):
    b = xcat.shape[0]
    # Large batch tile amortizes the ~0.35us per-grid-step overhead; only the
    # (tb,4) Xcat and (tb,32) out tiles stream (weights are grid-invariant and
    # stay VMEM-resident), so even tb=2048 is a few hundred KB of VMEM on any
    # generation (incl. v7x's 64 MiB).  Once the batch is big enough, pick tb so
    # the grid has >=2 steps and the "parallel" axis can shard across v7x's 2 TCs.
    tb = _round_up(b, 8)
    if b >= 1024:                               # enough rows to split across 2 TCs
        tb = _round_up(pl.cdiv(b, 2), 8)
    tb = min(tb, 2048)
    grid = (pl.cdiv(b, tb),)
    # NOTE: if b % tb != 0 the last Xcat tile reads padded rows; the resulting
    # junk activations are finite and discarded by output block masking.
    return pl.pallas_call(
        fused_kernel,
        out_shape=jax.ShapeDtypeStruct((b, W_PAGE_COLS), jnp.float32),
        grid=grid,
        in_specs=[
            pl.BlockSpec((tb, F_FEATS), lambda i: (i, 0)),                        # Xcat
            pl.BlockSpec((N_W_PAGES, W_PAGE_ROWS, W_PAGE_COLS), lambda i: (0, 0, 0)),  # weights
            pl.BlockSpec((N_B_PAGES, 1, W_PAGE_COLS), lambda i: (0, 0, 0)),            # biases
        ],
        out_specs=pl.BlockSpec((tb, W_PAGE_COLS), lambda i: (i, 0)),
        compiler_params=pltpu.CompilerParams(dimension_semantics=("parallel",)),
    )(xcat, w_slab, b_slab)


# ---------------------------------------------------------------------------
# Parameter init (PyTorch-like shapes) + one-time packing into two slabs
# ---------------------------------------------------------------------------
def init_params(key):
    keys = jax.random.split(key, 7)
    emb_keys = jax.random.split(keys[0], F_FEATS)
    emb_tables = [
        jax.random.normal(emb_keys[i], (NUM_CATEGORIES[i], EMB_DIM), jnp.float32) * 0.1
        for i in range(F_FEATS)
    ]
    # Linear weights stored transposed: (in, out), so kernel computes x @ W + b.
    w_first = jax.random.normal(keys[1], (IN_DIM, HIDDEN), jnp.float32) * 0.1
    b_first = jax.random.normal(keys[2], (HIDDEN,), jnp.float32) * 0.1
    w_inner = jax.random.normal(keys[3], (LAYERS, HIDDEN, HIDDEN), jnp.float32) * 0.1
    b_inner = jax.random.normal(keys[4], (LAYERS, HIDDEN), jnp.float32) * 0.1
    w_last = jax.random.normal(keys[5], (HIDDEN, OUT_DIM), jnp.float32) * 0.1
    b_last = jax.random.normal(keys[6], (OUT_DIM,), jnp.float32) * 0.1
    return dict(emb=emb_tables, w_first=w_first, b_first=b_first,
                w_inner=w_inner, b_inner=b_inner, w_last=w_last, b_last=b_last)


def pack_params(p, dtype=jnp.float32):
    """Pack all parameters into two slabs (done once, outside the hot path).

    Page 0 of the weight slab is the EXACT fold of the block-diagonal embedding
    table into the first Linear: onehot @ (E_blk @ W_first) == first(concat(emb)).
    """
    e_blk = jnp.zeros((W_PAGE_ROWS, IN_DIM), jnp.float32)
    for i, tbl in enumerate(p["emb"]):
        r0, c0 = OFFSETS[i], EMB_DIM * i
        e_blk = e_blk.at[r0:r0 + NUM_CATEGORIES[i], c0:c0 + EMB_DIM].set(tbl)
    w0 = e_blk @ p["w_first"]                                # (40, 32)

    w_slab = jnp.zeros((N_W_PAGES, W_PAGE_ROWS, W_PAGE_COLS), jnp.float32)
    w_slab = w_slab.at[0, :, :HIDDEN].set(w0)
    for l in range(LAYERS):
        w_slab = w_slab.at[1 + l, :HIDDEN, :HIDDEN].set(p["w_inner"][l])
    w_slab = w_slab.at[1 + LAYERS, :HIDDEN, :OUT_DIM].set(p["w_last"])

    b_slab = jnp.zeros((N_B_PAGES, 1, W_PAGE_COLS), jnp.float32)
    b_slab = b_slab.at[0, 0, :HIDDEN].set(p["b_first"])
    for l in range(LAYERS):
        b_slab = b_slab.at[1 + l, 0, :HIDDEN].set(p["b_inner"][l])
    b_slab = b_slab.at[1 + LAYERS, 0, :OUT_DIM].set(p["b_last"])
    # Biases stay f32 (bias add + ReLU run in f32 on the VPU); only the matmul
    # operands take the compute dtype.
    return w_slab.astype(dtype), b_slab


# ---------------------------------------------------------------------------
# Forward (one custom call) + pure-JAX reference
# ---------------------------------------------------------------------------
@jax.jit
def full_model_forward(w_slab, b_slab, Xcat, Xnum):
    del Xnum  # accepted but unused, exactly as in the PyTorch forward
    y = run_fused_kernel(Xcat, w_slab, b_slab)   # (B, 32) lane-dense slab
    return y[:, :OUT_DIM]                        # cheap wrapper-side slice


def full_model_ref(p, Xcat, Xnum):
    del Xnum
    xs = [p["emb"][i][Xcat[:, i]] for i in range(F_FEATS)]
    x = jnp.concatenate(xs, axis=1).astype(jnp.float32)
    h = jax.nn.relu(x @ p["w_first"] + p["b_first"])
    for l in range(LAYERS):
        h = jax.nn.relu(h @ p["w_inner"][l] + p["b_inner"][l])
    return jax.nn.relu(h @ p["w_last"] + p["b_last"])


if __name__ == "__main__":
    key = jax.random.PRNGKey(0)
    pkey, ckey, nkey = jax.random.split(key, 3)
    params = init_params(pkey)
    w_slab, b_slab = pack_params(params, dtype=COMPUTE_DTYPE)

    # Xcat: (B, F) integer category ids, each column in [0, n_i).
    ckeys = jax.random.split(ckey, F_FEATS)
    cols = [jax.random.randint(ckeys[i], (BATCH,), 0, NUM_CATEGORIES[i], dtype=jnp.int32)
            for i in range(F_FEATS)]
    Xcat = jnp.stack(cols, axis=1)                           # (8, 4) int32
    Xnum = jax.random.normal(nkey, (BATCH, 3), jnp.float32)  # unused, like PyTorch

    out = jax.block_until_ready(full_model_forward(w_slab, b_slab, Xcat, Xnum))

    ref = full_model_ref(params, Xcat, Xnum)
    assert out.shape == (BATCH, OUT_DIM), out.shape
    assert jnp.allclose(out, ref, atol=1e-4, rtol=1e-4), "mismatch vs reference"
    print("KERNEL_OK")
</pallas_src>

<mosaic_0001>
module attributes {stable_mosaic.version = 11 : i64} {
  func.func @fused_kernel(%arg0: i32, %arg1: memref<8x4xi32, #tpu.memory_space<vmem>>, %arg2: memref<4x40x32xf32, #tpu.memory_space<vmem>>, %arg3: memref<4x1x32xf32, #tpu.memory_space<vmem>>, %arg4: memref<8x32xf32, #tpu.memory_space<vmem>>) attributes {dimension_semantics = [#tpu.dimension_semantics<parallel>], iteration_bounds = array<i64: 1>, scalar_prefetch = 0 : i64, scratch_operands = 0 : i64, tpu.core_type = #tpu.core_type<tc>, window_params = [{transform_indices = @transform_0, window_bounds = array<i64: 8, 4>}, {pipeline_mode = #tpu.pipeline_mode<synchronous>, transform_indices = @transform_1, window_bounds = array<i64: 4, 40, 32>}, {pipeline_mode = #tpu.pipeline_mode<synchronous>, transform_indices = @transform_2, window_bounds = array<i64: 4, 1, 32>}, {transform_indices = @transform_3, window_bounds = array<i64: 8, 32>}]} {
    %c0 = arith.constant 0 : index
    %c0_0 = arith.constant 0 : index
    %0 = vector.load %arg1[%c0, %c0_0] : memref<8x4xi32, #tpu.memory_space<vmem>>, vector<8x4xi32>
    %1 = tpu.iota {dimensions = array<i32: 1>} : vector<8x40xi32>
    %2 = vector.extract_strided_slice %0 {offsets = [0, 0], sizes = [8, 1], strides = [1, 1]} : vector<8x4xi32> to vector<8x1xi32>
    %c0_i32 = arith.constant 0 : i32
    %3 = vector.broadcast %c0_i32 : i32 to vector<8x1xi32>
    %4 = arith.addi %2, %3 : vector<8x1xi32>
    %5 = vector.broadcast %4 : vector<8x1xi32> to vector<8x40xi32>
    %6 = arith.cmpi eq, %1, %5 : vector<8x40xi32>
    %7 = vector.extract_strided_slice %0 {offsets = [0, 1], sizes = [8, 1], strides = [1, 1]} : vector<8x4xi32> to vector<8x1xi32>
    %c10_i32 = arith.constant 10 : i32
    %8 = vector.broadcast %c10_i32 : i32 to vector<8x1xi32>
    %9 = arith.addi %7, %8 : vector<8x1xi32>
    %10 = vector.broadcast %9 : vector<8x1xi32> to vector<8x40xi32>
    %11 = arith.cmpi eq, %1, %10 : vector<8x40xi32>
    %12 = arith.ori %6, %11 : vector<8x40xi1>
    %13 = vector.extract_strided_slice %0 {offsets = [0, 2], sizes = [8, 1], strides = [1, 1]} : vector<8x4xi32> to vector<8x1xi32>
    %c17_i32 = arith.constant 17 : i32
    %14 = vector.broadcast %c17_i32 : i32 to vector<8x1xi32>
    %15 = arith.addi %13, %14 : vector<8x1xi32>
    %16 = vector.broadcast %15 : vector<8x1xi32> to vector<8x40xi32>
    %17 = arith.cmpi eq, %1, %16 : vector<8x40xi32>
    %18 = arith.ori %12, %17 : vector<8x40xi1>
    %19 = vector.extract_strided_slice %0 {offsets = [0, 3], sizes = [8, 1], strides = [1, 1]} : vector<8x4xi32> to vector<8x1xi32>
    %c22_i32 = arith.constant 22 : i32
    %20 = vector.broadcast %c22_i32 : i32 to vector<8x1xi32>
    %21 = arith.addi %19, %20 : vector<8x1xi32>
    %22 = vector.broadcast %21 : vector<8x1xi32> to vector<8x40xi32>
    %23 = arith.cmpi eq, %1, %22 : vector<8x40xi32>
    %24 = arith.ori %18, %23 : vector<8x40xi1>
    %25 = arith.extui %24 : vector<8x40xi1> to vector<8x40xi32>
    %26 = arith.sitofp %25 : vector<8x40xi32> to vector<8x40xf32>
    %c0_1 = arith.constant 0 : index
    %c0_2 = arith.constant 0 : index
    %c0_3 = arith.constant 0 : index
    %27 = vector.load %arg2[%c0_1, %c0_2, %c0_3] : memref<4x40x32xf32, #tpu.memory_space<vmem>>, vector<1x40x32xf32>
    %28 = vector.shape_cast %27 : vector<1x40x32xf32> to vector<40x32xf32>
    %cst = arith.constant dense<0.000000e+00> : vector<8x32xf32>
    %29 = tpu.matmul %26, %28, %cst {dimension_numbers = #tpu.dot_dimension_numbers<[1], [0], [0], [1], [0, 0, 1, 1], [], []>} : vector<8x40xf32>, vector<40x32xf32>, vector<8x32xf32> -> vector<8x32xf32>
    %c0_4 = arith.constant 0 : index
    %c0_5 = arith.constant 0 : index
    %c0_6 = arith.constant 0 : index
    %30 = vector.load %arg3[%c0_4, %c0_5, %c0_6] : memref<4x1x32xf32, #tpu.memory_space<vmem>>, vector<1x1x32xf32>
    %31 = vector.shape_cast %30 : vector<1x1x32xf32> to vector<1x32xf32>
    %32 = vector.broadcast %31 : vector<1x32xf32> to vector<8x32xf32>
    %33 = arith.addf %29, %32 : vector<8x32xf32>
    %cst_7 = arith.constant 0.000000e+00 : f32
    %34 = vector.broadcast %cst_7 : f32 to vector<8x32xf32>
    %35 = arith.maximumf %33, %34 : vector<8x32xf32>
    %c1 = arith.constant 1 : index
    %c0_8 = arith.constant 0 : index
    %c0_9 = arith.constant 0 : index
    %36 = vector.load %arg2[%c1, %c0_8, %c0_9] : memref<4x40x32xf32, #tpu.memory_space<vmem>>, vector<1x32x32xf32>
    %37 = vector.shape_cast %36 : vector<1x32x32xf32> to vector<32x32xf32>
    %cst_10 = arith.constant dense<0.000000e+00> : vector<8x32xf32>
    %38 = tpu.matmul %35, %37, %cst_10 {dimension_numbers = #tpu.dot_dimension_numbers<[1], [0], [0], [1], [0, 0, 1, 1], [], []>} : vector<8x32xf32>, vector<32x32xf32>, vector<8x32xf32> -> vector<8x32xf32>
    %c1_11 = arith.constant 1 : index
    %c0_12 = arith.constant 0 : index
    %c0_13 = arith.constant 0 : index
    %39 = vector.load %arg3[%c1_11, %c0_12, %c0_13] : memref<4x1x32xf32, #tpu.memory_space<vmem>>, vector<1x1x32xf32>
    %40 = vector.shape_cast %39 : vector<1x1x32xf32> to vector<1x32xf32>
    %41 = vector.broadcast %40 : vector<1x32xf32> to vector<8x32xf32>
    %42 = arith.addf %38, %41 : vector<8x32xf32>
    %cst_14 = arith.constant 0.000000e+00 : f32
    %43 = vector.broadcast %cst_14 : f32 to vector<8x32xf32>
    %44 = arith.maximumf %42, %43 : vector<8x32xf32>
    %c2 = arith.constant 2 : index
    %c0_15 = arith.constant 0 : index
    %c0_16 = arith.constant 0 : index
    %45 = vector.load %arg2[%c2, %c0_15, %c0_16] : memref<4x40x32xf32, #tpu.memory_space<vmem>>, vector<1x32x32xf32>
    %46 = vector.shape_cast %45 : vector<1x32x32xf32> to vector<32x32xf32>
    %cst_17 = arith.constant dense<0.000000e+00> : vector<8x32xf32>
    %47 = tpu.matmul %44, %46, %cst_17 {dimension_numbers = #tpu.dot_dimension_numbers<[1], [0], [0], [1], [0, 0, 1, 1], [], []>} : vector<8x32xf32>, vector<32x32xf32>, vector<8x32xf32> -> vector<8x32xf32>
    %c2_18 = arith.constant 2 : index
    %c0_19 = arith.constant 0 : index
    %c0_20 = arith.constant 0 : index
    %48 = vector.load %arg3[%c2_18, %c0_19, %c0_20] : memref<4x1x32xf32, #tpu.memory_space<vmem>>, vector<1x1x32xf32>
    %49 = vector.shape_cast %48 : vector<1x1x32xf32> to vector<1x32xf32>
    %50 = vector.broadcast %49 : vector<1x32xf32> to vector<8x32xf32>
    %51 = arith.addf %47, %50 : vector<8x32xf32>
    %cst_21 = arith.constant 0.000000e+00 : f32
    %52 = vector.broadcast %cst_21 : f32 to vector<8x32xf32>
    %53 = arith.maximumf %51, %52 : vector<8x32xf32>
    %c3 = arith.constant 3 : index
    %c0_22 = arith.constant 0 : index
    %c0_23 = arith.constant 0 : index
    %54 = vector.load %arg2[%c3, %c0_22, %c0_23] : memref<4x40x32xf32, #tpu.memory_space<vmem>>, vector<1x32x32xf32>
    %55 = vector.shape_cast %54 : vector<1x32x32xf32> to vector<32x32xf32>
    %cst_24 = arith.constant dense<0.000000e+00> : vector<8x32xf32>
    %56 = tpu.matmul %53, %55, %cst_24 {dimension_numbers = #tpu.dot_dimension_numbers<[1], [0], [0], [1], [0, 0, 1, 1], [], []>} : vector<8x32xf32>, vector<32x32xf32>, vector<8x32xf32> -> vector<8x32xf32>
    %c3_25 = arith.constant 3 : index
    %c0_26 = arith.constant 0 : index
    %c0_27 = arith.constant 0 : index
    %57 = vector.load %arg3[%c3_25, %c0_26, %c0_27] : memref<4x1x32xf32, #tpu.memory_space<vmem>>, vector<1x1x32xf32>
    %58 = vector.shape_cast %57 : vector<1x1x32xf32> to vector<1x32xf32>
    %59 = vector.broadcast %58 : vector<1x32xf32> to vector<8x32xf32>
    %60 = arith.addf %56, %59 : vector<8x32xf32>
    %cst_28 = arith.constant 0.000000e+00 : f32
    %61 = vector.broadcast %cst_28 : f32 to vector<8x32xf32>
    %62 = arith.maximumf %60, %61 : vector<8x32xf32>
    %c0_29 = arith.constant 0 : index
    %c0_30 = arith.constant 0 : index
    %63 = vector.load %arg4[%c0_29, %c0_30] : memref<8x32xf32, #tpu.memory_space<vmem>>, vector<8x32xf32>
    tpu.vector_store %arg4[%c0_29, %c0_30], %62 {strides = array<i32>} : memref<8x32xf32, #tpu.memory_space<vmem>>, vector<8x32xf32>,
    return
  }
  func.func @transform_0(%arg0: i32) -> (i32, i32) {
    %c0_i32 = arith.constant 0 : i32
    %c0_i32_0 = arith.constant 0 : i32
    return %arg0, %c0_i32 : i32, i32
  }
  func.func @transform_1(%arg0: i32) -> (i32, i32, i32) {
    %c0_i32 = arith.constant 0 : i32
    %c0_i32_0 = arith.constant 0 : i32
    %c0_i32_1 = arith.constant 0 : i32
    %c0_i32_2 = arith.constant 0 : i32
    return %c0_i32, %c0_i32_0, %c0_i32_1 : i32, i32, i32
  }
  func.func @transform_2(%arg0: i32) -> (i32, i32, i32) {
    %c0_i32 = arith.constant 0 : i32
    %c0_i32_0 = arith.constant 0 : i32
    %c0_i32_1 = arith.constant 0 : i32
    %c0_i32_2 = arith.constant 0 : i32
    return %c0_i32, %c0_i32_0, %c0_i32_1 : i32, i32, i32
  }
  func.func @transform_3(%arg0: i32) -> (i32, i32) {
    %c0_i32 = arith.constant 0 : i32
    %c0_i32_0 = arith.constant 0 : i32
    return %arg0, %c0_i32 : i32, i32
  }
}

</mosaic_0001>

<bundles_post_ra>
// kernel: full_model_forward.1
= control target key start
LH: loop header
LB: loop body
LE: loop exit
PB: predicated region body
PF: predicated region fallthrough
CT: control target
= control target key end

     0   :  { %v522_v0 = vmov 0   ;;  %v523_v2 = vmov 2   ;;  %v524_v6 = vmov 0.0|0.0   ;;  %v525_v13 = vmov 1   ;;  %s634_s0 = inlined_call_operand.vmem [shape: s32[8,4], index: 0, kind: input, shape index: {}]   ;;  %s635_s1 = inlined_call_operand.vmem [shape: f32[4,40,32], index: 1, kind: input, shape index: {}]   ;;  %s636_s2 = inlined_call_operand.vmem [shape: f32[4,1,32], index: 2, kind: input, shape index: {}]   ;;  %s637_s3 = inlined_call_operand.vmem [shape: f32[8,32], index: 3, kind: output, shape index: {}]  }
   0x1   :  { %517 = vset.pattern.permute.xlu0 %v522_v0  ;;  %v14_v1 = vld [vmem:[%s634_s0] sm:$0xff]  ;;  %519 = vset.pattern.permute.xlu1 %v523_v2  ;;  %v42_v4 = vld [vmem:[%s635_s1 + $0x8] sm:$0xff]  ;;  %v43_v9 = vld [vmem:[%s635_s1 + $0x10] sm:$0xff]  ;;  %v526_v14 = vmov 3   ;;  %v527_v15 = vmov 0.0   ;;  %vm528_vm0 = vmmov 0   ;;  %v15_v20 = vlaneseq }
   0x2   :  { %v41_v3 = vld [vmem:[%s635_s1] sm:$0xff]  ;;  %18 = vperm.xlu0 %517, %v14_v1   ;;  %v27_v5 = vadd.s32 17, %v14_v1  ;;  %486 = vmatprep.subr.bf16.mxu0 %v524_v6  ;;  %v21_v8 = vadd.s32 10, %v14_v1  ;;  %v44_v10 = vld [vmem:[%s635_s1 + $0x18] sm:$0xff]  ;;  %v33_v11 = vadd.s32 22, %v14_v1  ;;  %v398_v17 = vld [vmem:[%s635_s1 + $0x28] sm:$0xff] }
   0x3   :  { %v487_v7 = vpack.c.bf16 %v42_v4, %v41_v3  ;;  %492 = vmatprep.subr.bf16.mxu1 %v524_v6  ;;  %v490_v12 = vpack.c.bf16 %v44_v10, %v43_v9  ;;  %v45_v16 = vld [vmem:[%s635_s1 + $0x20] sm:$0xff]  ;;  %450 = vmatprep.mubr.msk.f32.mxu0 %vm528_vm0, %v527_v15  ;;  %v399_v18 = vld [vmem:[%s635_s1 + $0x30] sm:$0xff]  ;;  %v16_v22 = vand.u32 127, %v15_v20  ;;  %vm53_vm7 = vcmask 326656   ;;  %v400_v27 = vld [vmem:[%s635_s1 + $0x38] sm:$0xff] }
   0x4   :  { %29 = vperm.xlu1 %519, %v27_v5   ;;  %461 = vmatprep.mubr.msk.f32.mxu1 %vm528_vm0, %v527_v15  ;;  %v493_v19 = vpack.c.bf16 %v399_v18, %v398_v17  ;;  %v401_v28 = vld [vmem:[%s635_s1 + $0x40] sm:$0xff]  ;;  %v405_v31 = vld [vmem:[%s635_s1 + $0x50] sm:$0xff]  ;;  %v406_v32 = vld [vmem:[%s635_s1 + $0x58] sm:$0xff]  ;;  %vm141_vm9 = vcmask 261120  }
   0x5   :  { %488 = vmatpush3.bf16.msra.mxu0 %v487_v7  ;;  %v496_v29 = vpack.c.bf16 %v401_v28, %v400_v27  ;;  %v396_v30 = vld [vmem:[%s636_s2] ss:$0 sm:$0xff]  ;;  %v499_v36 = vpack.c.bf16 %v406_v32, %v405_v31  ;;  %v408_v39 = vld [vmem:[%s635_s1 + $0x68] sm:$0xff]  ;;  %v412_v41 = vld [vmem:[%s635_s1 + $0x78] sm:$0xff] }
   0x6   :  { %489 = vmatprep.subr.bf16.mxu0 %v524_v6  ;;  %518 = vset.pattern.permute.xlu0 %v525_v13  ;;  %v407_v38 = vld [vmem:[%s635_s1 + $0x60] sm:$0xff]  ;;  %v414_v49 = vld [vmem:[%s635_s1 + $0x88] sm:$0xff]  ;;  %v415_v50 = vld [vmem:[%s635_s1 + $0x90] sm:$0xff] }
   0x7   :  { %23 = vperm.xlu0 %518, %v21_v8   ;;  %494 = vmatpush3.bf16.msra.mxu1 %v493_v19  ;;  %v502_v40 = vpack.c.bf16 %v408_v39, %v407_v38  ;;  %v413_v42 = vld [vmem:[%s635_s1 + $0x80] sm:$0xff]  ;;  %v508_v51 = vpack.c.bf16 %v415_v50, %v414_v49 }
   0x8   :  { %520 = vset.pattern.permute.xlu1 %v526_v14  ;;  %495 = vmatprep.subr.bf16.mxu1 %v524_v6  ;;  %v505_v43 = vpack.c.bf16 %v413_v42, %v412_v41  ;;  %v403_v44 = vld [vmem:[%s636_s2 + $0x1] ss:$0 sm:$0xff]  ;;  %v410_v52 = vld [vmem:[%s636_s2 + $0x2] ss:$0 sm:$0xff]  ;;  %v417_v57 = vld [vmem:[%s636_s2 + $0x3] ss:$0 sm:$0xff] }
   0x9   :  { %491 = vmatpush3.bf16.msra.mxu0 %v490_v12  ;;  %35 = vperm.xlu1 %520, %v33_v11  }
   0xa   :  { %448 = vmatprep.subr.mxu0 %v527_v15 }
   0xb   :  { %521 = vset.pattern.permute.xlu0 %v526_v14  ;;  %497 = vmatpush3.bf16.msra.mxu1 %v496_v29 }
   0xc   :  { %498 = vmatprep.subr.bf16.mxu1 %v524_v6 }
   0xd   :  { %449 = vmatpush3.msra.mxu0 %v45_v16 }
   0xe   :  { %504 = vmatprep.subr.bf16.mxu0 %v524_v6 }
  0x81   :  { %v19_v21 = vpop.permute.xlu0 %18 }
  0x82   :  { %vm20_vm1 = vcmp.eq.s32.totalorder %v16_v22, %v19_v21 }
  0x83   :  { %v30_v23 = vpop.permute.xlu1 %29 }
  0x84   :  { %vm31_vm3 = vcmp.eq.s32.totalorder %v16_v22, %v30_v23 }
  0x86   :  { %v24_v24 = vpop.permute.xlu0 %23 }
  0x87   :  { %vm25_vm2 = vcmp.eq.s32.totalorder %v16_v22, %v24_v24 }
  0x88   :  { %vm26_vm4 = vmor %vm20_vm1, %vm25_vm2  ;;  %v36_v25 = vpop.permute.xlu1 %35 }
  0x89   :  { %vm32_vm5 = vmor %vm26_vm4, %vm31_vm3  ;;  %vm37_vm6 = vcmp.eq.s32.totalorder %v16_v22, %v36_v25 }
  0x8a   :  { %vm38_vm8 = vmor %vm32_vm5, %vm37_vm6 }
  0x8b   :  { %v395_v26 = vsel %vm38_vm8, 1.0, %v527_v15 }
  0x8c   :  { %451 = vmatmul.mubr.msk.f32.vlgmr.msra.gmra.mrb[0].mxu0 %vm53_vm7, %v395_v26 }
  0x8d   :  { %483 = vmatprep.mubr.msk.f32.mxu0 %vm528_vm0, %v527_v15  ;;  %506 = vmatpush3.bf16.msra.mxu0 %v505_v43 }
  0x8e   :  { %507 = vmatprep.subr.bf16.mxu0 %v524_v6 }
  0x91   :  { %509 = vmatpush3.bf16.msra.mxu0 %v508_v51 }
 0x15f   :  { %v123_v33 = vpop.f32.mrb[0].mxu0 }
 0x160   :  { %v124_v34 = vadd.f32 %v396_v30, %v123_v33  ;;  %v452_v35 = vpop.f32.mrb[1].mxu0 }
 0x162   :  { %v127_v37 = vmax.f32 %v124_v34, 0.0 }
 0x164   :  { %462 = vmatmul.mubr.msk.f32.vlgmr.msra.gmra.mrb[0].mxu1 %vm141_vm9, %v127_v37 }
 0x165   :  { %500 = vmatpush3.bf16.msra.mxu1 %v499_v36  ;;  %472 = vmatprep.mubr.msk.f32.mxu1 %vm528_vm0, %v527_v15 }
 0x166   :  { %501 = vmatprep.subr.bf16.mxu1 %v524_v6 }
 0x169   :  { %503 = vmatpush3.bf16.msra.mxu1 %v502_v40 }
 0x237   :  { %v211_v45 = vpop.f32.mrb[0].mxu1 }
 0x238   :  { %v212_v46 = vadd.f32 %v403_v44, %v211_v45  ;;  %v463_v47 = vpop.f32.mrb[1].mxu1 }
 0x23a   :  { %v215_v48 = vmax.f32 %v212_v46, 0.0 }
 0x23c   :  { %473 = vmatmul.mubr.msk.f32.vlgmr.msra.gmra.mrb[2].mxu1 %vm141_vm9, %v215_v48 }
 0x30f   :  { %v298_v53 = vpop.f32.mrb[2].mxu1 }
 0x310   :  { %v299_v54 = vadd.f32 %v410_v52, %v298_v53  ;;  %v474_v55 = vpop.f32.mrb[3].mxu1 }
 0x312   :  { %v302_v56 = vmax.f32 %v299_v54, 0.0 }
 0x314   :  { %484 = vmatmul.mubr.msk.f32.vlgmr.msra.gmra.mrb[2].mxu0 %vm141_vm9, %v302_v56 }
 0x3e7   :  { %v385_v58 = vpop.f32.mrb[2].mxu0 }
 0x3e8   :  { %v386_v59 = vadd.f32 %v417_v57, %v385_v58  ;;  %v485_v60 = vpop.f32.mrb[3].mxu0 }
 0x3ea   :  { %v389_v61 = vmax.f32 %v386_v59, 0.0 }
 0x3ec   :  { %390 = vst.msk [vmem:[%s637_s3] sm:$0xff] %vm141_vm9, %v389_v61 }

</bundles_post_ra>
